<compile_context>
chip_gen: v7x
topology: tpu7x:2x2x1
jax: 0.10.0
libtpu: 0.0.40
codegen_flags: <defaults>
</compile_context>

<pallas_src>
import functools

import jax
import jax.numpy as jnp
from jax.experimental import pallas as pl
from jax.experimental.pallas import tpu as pltpu


def _round_up(x, m):
    return (x + m - 1) // m * m


def _gru_ode_kernel(h_ref, wrz_ref, brz_ref, wh_ref, bh_ref, out_ref):
    """One batch tile (batch on lanes) of the GRU-ODE drift: dh = (1-z)*(u-h).

    Feature-major ("transposed") layout, Dp = round_up(D, 8):
      h_ref   [Dp, tb]    hidden-state tile (features on sublanes, batch lanes)
      wrz_ref [2Dp, Dp]   fused r/z weight (rows = output channels, padded)
      brz_ref [2Dp, 1]
      wh_ref  [Dp, Dp]
      bh_ref  [Dp, 1]
      out_ref [Dp, tb]
    """
    Dp = wh_ref.shape[0]
    h_in = h_ref[...]                        # storage dtype (MXU rhs)
    h = h_in.astype(jnp.float32)             # f32 copy for elementwise math

    # Fused r/z gate pre-activations: one MXU pass over the [2Dp, Dp] weight.
    gate_pre = (
        jnp.dot(wrz_ref[...], h_in, preferred_element_type=jnp.float32)
        + brz_ref[...].astype(jnp.float32))                  # [2Dp, tb]
    # sigmoid(x) == 0.5 * (tanh(0.5 * x) + 1): one EUP push per gate element.
    gates = 0.5 * (jnp.tanh(0.5 * gate_pre) + 1.0)
    r = gates[:Dp, :]                        # sublane-tile aligned (Dp % 8 == 0)
    z = gates[Dp:, :]

    # Padded feature rows of h are zero, so r*h stays zero there and padded
    # rows never contaminate real outputs (no NaNs under debug checks).
    rh = (r * h).astype(wh_ref.dtype)
    u = jnp.tanh(
        jnp.dot(wh_ref[...], rh, preferred_element_type=jnp.float32)
        + bh_ref[...].astype(jnp.float32))

    out_ref[...] = ((1.0 - z) * (u - h)).astype(out_ref.dtype)


@functools.partial(jax.jit, static_argnames=("batch_tile",))
def gru_hidden_state_odefunc_forward(t, tpp_state, packed_params, *,
                                     batch_tile=None):
    """forward(t, tpp_state) -> dstate, i.e. dstate_net(t, tpp_state).

    t is accepted for API parity but unused (the GRU-ODE drift is autonomous),
    exactly mirroring GRUHiddenStateODEFunc.forward.
    packed_params comes from pack_params() (fused / padded / feature-major).
    """
    del t  # unused by the autonomous GRU-ODE drift (matches reference)
    w_rzt = packed_params["w_rzt"]
    b_rzt = packed_params["b_rzt"]
    w_ht = packed_params["w_ht"]
    b_ht = packed_params["b_ht"]

    B, D = tpp_state.shape
    Dp = w_ht.shape[0]
    assert Dp % 8 == 0 and Dp >= D
    assert w_rzt.shape == (2 * Dp, Dp) and b_rzt.shape == (2 * Dp, 1)

    # Lane-dense layout: batch -> lanes, features -> sublanes.  Wrapper-side
    # transpose / pad is layout plumbing, not compute.
    h_t = tpp_state.T                                      # [D, B]
    if Dp > D:
        h_t = jnp.pad(h_t, ((0, Dp - D), (0, 0)))          # [Dp, B]

    itemsize = tpp_state.dtype.itemsize
    # D-aware batch tile: target ~1 MiB streamed state block (amortizes the
    # ~0.35us/step grid overhead); lane dim must be a multiple of 128 when the
    # batch is actually tiled.
    if batch_tile is None:
        tb = max(256, (1 << 20) // max(Dp * itemsize, 1))
    else:
        tb = int(batch_tile)
    if tb >= B:
        tb = B                        # single block covers the whole batch
    else:
        tb = max(128, (tb // 128) * 128)
    grid = (pl.cdiv(B, tb),)

    state_spec = pl.BlockSpec((Dp, tb), lambda i: (0, i))
    # Grid-invariant operands: single-buffered (nothing to prefetch across
    # grid steps), halving their VMEM footprint vs. default double-buffering.
    single = pl.Buffered(1)
    wrz_spec = pl.BlockSpec((2 * Dp, Dp), lambda i: (0, 0), pipeline_mode=single)
    brz_spec = pl.BlockSpec((2 * Dp, 1), lambda i: (0, 0), pipeline_mode=single)
    wh_spec = pl.BlockSpec((Dp, Dp), lambda i: (0, 0), pipeline_mode=single)
    bh_spec = pl.BlockSpec((Dp, 1), lambda i: (0, 0), pipeline_mode=single)

    # VMEM budget: resident weights (1 buffer each) + double-buffered state /
    # output tiles + slack, clamped to the physical per-core capacity (64 MiB
    # on v7x) minus headroom.  Covers v5e's 16 MiB default scoped limit.
    w_bytes = sum(int(x.size) * x.dtype.itemsize
                  for x in (w_rzt, b_rzt, w_ht, b_ht))
    s_bytes = 2 * 2 * Dp * tb * itemsize
    try:
        vmem_cap = int(pltpu.get_tpu_info().vmem_capacity_bytes)
    except Exception:
        vmem_cap = 64 << 20           # conservative fallback (v7x per-core)
    vmem_limit = max(w_bytes + s_bytes + (4 << 20), 32 << 20)
    vmem_limit = int(min(vmem_limit, vmem_cap - (8 << 20)))

    cost = pl.CostEstimate(
        flops=6 * B * Dp * Dp,                 # [2Dp,Dp] and [Dp,Dp] matmuls
        transcendentals=3 * B * Dp,            # tanh for r, z, u
        bytes_accessed=w_bytes + 2 * B * Dp * itemsize)

    out_t = pl.pallas_call(
        _gru_ode_kernel,
        out_shape=jax.ShapeDtypeStruct((Dp, B), tpp_state.dtype),
        grid_spec=pltpu.PrefetchScalarGridSpec(
            num_scalar_prefetch=0,
            grid=grid,
            in_specs=[state_spec, wrz_spec, brz_spec, wh_spec, bh_spec],
            out_specs=state_spec,
        ),
        compiler_params=pltpu.CompilerParams(
            dimension_semantics=("parallel",),   # batch tiles are independent
            vmem_limit_bytes=vmem_limit),
        cost_estimate=cost,
    )(h_t, w_rzt, b_rzt, w_ht, b_ht)

    # Back to the reference [B, D] layout (drop feature padding).
    return out_t[:D, :].T


def init_params(key, hidden_dim, dtype=jnp.float32):
    """nn.Linear-style params in the PyTorch layout: W [out, in], b [out]."""
    ks = jax.random.split(key, 6)
    bound = float(hidden_dim) ** -0.5

    def u(k, shape):
        return jax.random.uniform(k, shape, jnp.float32, -bound,
                                  bound).astype(dtype)

    return {
        "w_r": u(ks[0], (hidden_dim, hidden_dim)),
        "b_r": u(ks[1], (hidden_dim,)),
        "w_z": u(ks[2], (hidden_dim, hidden_dim)),
        "b_z": u(ks[3], (hidden_dim,)),
        "w_h": u(ks[4], (hidden_dim, hidden_dim)),
        "b_h": u(ks[5], (hidden_dim,)),
    }


def pack_params(params):
    """Fuse / pad / lay out torch-style weights for the lane-dense kernel.

    The kernel computes W @ h^T (== (h @ W^T)^T), so the torch [out, in]
    weight is used as-is; r/z weights stack along the output axis and every
    feature axis is zero-padded to Dp = round_up(D, 8) so the in-kernel gate
    split lands on a sublane-tile boundary.  Call once per parameter set, not
    per forward evaluation.
    """
    D = params["w_h"].shape[0]
    Dp = _round_up(D, 8)

    def pad_w(w):
        return jnp.pad(w, ((0, Dp - D), (0, Dp - D)))

    def pad_b(b):
        return jnp.pad(b, (0, Dp - D)).reshape(Dp, 1)

    return {
        "w_rzt": jnp.concatenate([pad_w(params["w_r"]), pad_w(params["w_z"])],
                                 axis=0),
        "b_rzt": jnp.concatenate([pad_b(params["b_r"]), pad_b(params["b_z"])],
                                 axis=0),
        "w_ht": pad_w(params["w_h"]),
        "b_ht": pad_b(params["b_h"]),
    }


def _reference_forward(t, h, params):
    """Pure-JAX reference mirroring the PyTorch GRU-ODE drift net (f32 math)."""
    del t
    f32 = lambda x: x.astype(jnp.float32)
    h32 = f32(h)
    r = jax.nn.sigmoid(h32 @ f32(params["w_r"]).T + f32(params["b_r"]))
    z = jax.nn.sigmoid(h32 @ f32(params["w_z"]).T + f32(params["b_z"]))
    u = jnp.tanh((r * h32) @ f32(params["w_h"]).T + f32(params["b_h"]))
    return (1.0 - z) * (u - h32)


if __name__ == "__main__":
    B, D = 8, 32  # batch, hidden-state dim of the TPP hidden state

    key = jax.random.PRNGKey(0)
    k_param, k_state = jax.random.split(key)
    t = jnp.float32(0.5)

    # --- f32 path: exact parity with the PyTorch module ---
    params = init_params(k_param, D, dtype=jnp.float32)
    packed = pack_params(params)
    tpp_state = jax.random.normal(k_state, (B, D), jnp.float32)

    dstate = jax.block_until_ready(
        gru_hidden_state_odefunc_forward(t, tpp_state, packed))
    ref = _reference_forward(t, tpp_state, params)
    assert dstate.shape == (B, D) and dstate.dtype == jnp.float32
    assert jnp.allclose(dstate, ref, atol=1e-5, rtol=1e-5)

    # --- bf16 weights + state: half the VMEM/HBM traffic, f32 accumulation ---
    params_bf16 = jax.tree_util.tree_map(
        lambda x: x.astype(jnp.bfloat16), params)
    packed_bf16 = pack_params(params_bf16)
    state_bf16 = tpp_state.astype(jnp.bfloat16)
    dstate_bf16 = jax.block_until_ready(
        gru_hidden_state_odefunc_forward(t, state_bf16, packed_bf16))
    ref_bf16 = _reference_forward(t, state_bf16, params_bf16)
    assert dstate_bf16.dtype == jnp.bfloat16
    assert jnp.allclose(dstate_bf16.astype(jnp.float32), ref_bf16,
                        atol=5e-2, rtol=5e-2)

    # --- larger batch: exercises the multi-tile, lane-dense grid path ---
    B2, D2 = 1024, 64
    params2 = init_params(k_param, D2, dtype=jnp.float32)
    packed2 = pack_params(params2)
    state2 = jax.random.normal(k_state, (B2, D2), jnp.float32)
    dstate2 = jax.block_until_ready(
        gru_hidden_state_odefunc_forward(t, state2, packed2, batch_tile=512))
    ref2 = _reference_forward(t, state2, params2)
    assert dstate2.shape == (B2, D2)
    assert jnp.allclose(dstate2, ref2, atol=5e-3, rtol=5e-3)

    print("KERNEL_OK")
</pallas_src>

<mosaic_0001>
module attributes {stable_mosaic.version = 11 : i64} {
  func.func @_gru_ode_kernel(%arg0: i32, %arg1: memref<32x8xf32, #tpu.memory_space<vmem>>, %arg2: memref<64x32xf32, #tpu.memory_space<vmem>>, %arg3: memref<64x1xf32, #tpu.memory_space<vmem>>, %arg4: memref<32x32xf32, #tpu.memory_space<vmem>>, %arg5: memref<32x1xf32, #tpu.memory_space<vmem>>, %arg6: memref<32x8xf32, #tpu.memory_space<vmem>>) attributes {dimension_semantics = [#tpu.dimension_semantics<parallel>], iteration_bounds = array<i64: 1>, scalar_prefetch = 0 : i64, scratch_operands = 0 : i64, tpu.core_type = #tpu.core_type<tc>, window_params = [{transform_indices = @transform_0, window_bounds = array<i64: 32, 8>}, {pipeline_mode = #tpu.pipeline_mode<synchronous>, transform_indices = @transform_1, window_bounds = array<i64: 64, 32>}, {pipeline_mode = #tpu.pipeline_mode<synchronous>, transform_indices = @transform_2, window_bounds = array<i64: 64, 1>}, {pipeline_mode = #tpu.pipeline_mode<synchronous>, transform_indices = @transform_3, window_bounds = array<i64: 32, 32>}, {pipeline_mode = #tpu.pipeline_mode<synchronous>, transform_indices = @transform_4, window_bounds = array<i64: 32, 1>}, {transform_indices = @transform_5, window_bounds = array<i64: 32, 8>}]} {
    %c0 = arith.constant 0 : index
    %c0_0 = arith.constant 0 : index
    %0 = vector.load %arg1[%c0, %c0_0] : memref<32x8xf32, #tpu.memory_space<vmem>>, vector<32x8xf32>
    %c0_1 = arith.constant 0 : index
    %c0_2 = arith.constant 0 : index
    %1 = vector.load %arg2[%c0_1, %c0_2] : memref<64x32xf32, #tpu.memory_space<vmem>>, vector<64x32xf32>
    %cst = arith.constant dense<0.000000e+00> : vector<64x8xf32>
    %2 = tpu.matmul %1, %0, %cst {dimension_numbers = #tpu.dot_dimension_numbers<[1], [0], [0], [1], [0, 0, 1, 1], [], []>} : vector<64x32xf32>, vector<32x8xf32>, vector<64x8xf32> -> vector<64x8xf32>
    %c0_3 = arith.constant 0 : index
    %c0_4 = arith.constant 0 : index
    %3 = vector.load %arg3[%c0_3, %c0_4] : memref<64x1xf32, #tpu.memory_space<vmem>>, vector<64x1xf32>
    %4 = vector.broadcast %3 : vector<64x1xf32> to vector<64x8xf32>
    %5 = arith.addf %2, %4 : vector<64x8xf32>
    %cst_5 = arith.constant 5.000000e-01 : f32
    %6 = vector.broadcast %cst_5 : f32 to vector<64x8xf32>
    %7 = arith.mulf %6, %5 : vector<64x8xf32>
    %8 = math.tanh %7 : vector<64x8xf32>
    %cst_6 = arith.constant 1.000000e+00 : f32
    %9 = vector.broadcast %cst_6 : f32 to vector<64x8xf32>
    %10 = arith.addf %8, %9 : vector<64x8xf32>
    %cst_7 = arith.constant 5.000000e-01 : f32
    %11 = vector.broadcast %cst_7 : f32 to vector<64x8xf32>
    %12 = arith.mulf %11, %10 : vector<64x8xf32>
    %13 = vector.extract_strided_slice %12 {offsets = [0, 0], sizes = [32, 8], strides = [1, 1]} : vector<64x8xf32> to vector<32x8xf32>
    %14 = vector.extract_strided_slice %12 {offsets = [32, 0], sizes = [32, 8], strides = [1, 1]} : vector<64x8xf32> to vector<32x8xf32>
    %15 = arith.mulf %13, %0 : vector<32x8xf32>
    %c0_8 = arith.constant 0 : index
    %c0_9 = arith.constant 0 : index
    %16 = vector.load %arg4[%c0_8, %c0_9] : memref<32x32xf32, #tpu.memory_space<vmem>>, vector<32x32xf32>
    %cst_10 = arith.constant dense<0.000000e+00> : vector<32x8xf32>
    %17 = tpu.matmul %16, %15, %cst_10 {dimension_numbers = #tpu.dot_dimension_numbers<[1], [0], [0], [1], [0, 0, 1, 1], [], []>} : vector<32x32xf32>, vector<32x8xf32>, vector<32x8xf32> -> vector<32x8xf32>
    %c0_11 = arith.constant 0 : index
    %c0_12 = arith.constant 0 : index
    %18 = vector.load %arg5[%c0_11, %c0_12] : memref<32x1xf32, #tpu.memory_space<vmem>>, vector<32x1xf32>
    %19 = vector.broadcast %18 : vector<32x1xf32> to vector<32x8xf32>
    %20 = arith.addf %17, %19 : vector<32x8xf32>
    %21 = math.tanh %20 : vector<32x8xf32>
    %cst_13 = arith.constant 1.000000e+00 : f32
    %22 = vector.broadcast %cst_13 : f32 to vector<32x8xf32>
    %23 = arith.subf %22, %14 : vector<32x8xf32>
    %24 = arith.subf %21, %0 : vector<32x8xf32>
    %25 = arith.mulf %23, %24 : vector<32x8xf32>
    %c0_14 = arith.constant 0 : index
    %c0_15 = arith.constant 0 : index
    %26 = vector.load %arg6[%c0_14, %c0_15] : memref<32x8xf32, #tpu.memory_space<vmem>>, vector<32x8xf32>
    tpu.vector_store %arg6[%c0_14, %c0_15], %25 {strides = array<i32>} : memref<32x8xf32, #tpu.memory_space<vmem>>, vector<32x8xf32>,
    return
  }
  func.func @transform_0(%arg0: i32) -> (i32, i32) {
    %c0_i32 = arith.constant 0 : i32
    %c0_i32_0 = arith.constant 0 : i32
    return %c0_i32, %arg0 : i32, i32
  }
  func.func @transform_1(%arg0: i32) -> (i32, i32) {
    %c0_i32 = arith.constant 0 : i32
    %c0_i32_0 = arith.constant 0 : i32
    %c0_i32_1 = arith.constant 0 : i32
    return %c0_i32, %c0_i32_0 : i32, i32
  }
  func.func @transform_2(%arg0: i32) -> (i32, i32) {
    %c0_i32 = arith.constant 0 : i32
    %c0_i32_0 = arith.constant 0 : i32
    %c0_i32_1 = arith.constant 0 : i32
    return %c0_i32, %c0_i32_0 : i32, i32
  }
  func.func @transform_3(%arg0: i32) -> (i32, i32) {
    %c0_i32 = arith.constant 0 : i32
    %c0_i32_0 = arith.constant 0 : i32
    %c0_i32_1 = arith.constant 0 : i32
    return %c0_i32, %c0_i32_0 : i32, i32
  }
  func.func @transform_4(%arg0: i32) -> (i32, i32) {
    %c0_i32 = arith.constant 0 : i32
    %c0_i32_0 = arith.constant 0 : i32
    %c0_i32_1 = arith.constant 0 : i32
    return %c0_i32, %c0_i32_0 : i32, i32
  }
  func.func @transform_5(%arg0: i32) -> (i32, i32) {
    %c0_i32 = arith.constant 0 : i32
    %c0_i32_0 = arith.constant 0 : i32
    return %c0_i32, %arg0 : i32, i32
  }
}

</mosaic_0001>

<bundles_post_ra>
// kernel: gru_hidden_state_odefunc_forward.1
= control target key start
LH: loop header
LB: loop body
LE: loop exit
PB: predicated region body
PF: predicated region fallthrough
CT: control target
= control target key end

     0   :  { %vm80_vm0 = vcmask 261120   ;;  %v505_v3 = vmov 0   ;;  %vm387_vm1 = vcmask 64512   ;;  %s664_s0 = inlined_call_operand.vmem [shape: f32[32,8], index: 0, kind: input, shape index: {}]   ;;  %s665_s1 = inlined_call_operand.vmem [shape: f32[64,32], index: 1, kind: input, shape index: {}]   ;;  %s666_s2 = inlined_call_operand.vmem [shape: f32[64,1], index: 2, kind: input, shape index: {}]   ;;  %s667_s4 = inlined_call_operand.vmem [shape: f32[32,1], index: 4, kind: input, shape index: {}]   ;;  %s668_s3 = inlined_call_operand.vmem [shape: f32[32,32], index: 3, kind: input, shape index: {}]   ;;  %s669_s5 = inlined_call_operand.vmem [shape: f32[32,8], index: 5, kind: output, shape index: {}]  }
   0x1   :  { %v539_v0 = vld [vmem:[%s664_s0] sm:$0xff]  ;;  %v544_v1 = vld [vmem:[%s664_s0 + $0x8] sm:$0xff]  ;;  %v549_v2 = vld [vmem:[%s664_s0 + $0x10] sm:$0xff]  ;;  %479 = vset.pattern.permute.xlu0 %v505_v3  ;;  %480 = vset.pattern.permute.xlu1 %v505_v3 }
   0x2   :  { %v462_v4 = vpack.c.bf16 %v544_v1, %v539_v0  ;;  %v556_v5 = vld [vmem:[%s664_s0 + $0x18] sm:$0xff]  ;;  %v24_v6 = vld [vmem:[%s665_s1] sm:$0xff]  ;;  %v34_v9 = vld [vmem:[%s666_s2 + $0x10] sm:$0xff] }
   0x3   :  { %v466_v7 = vpack.c.bf16 %v556_v5, %v549_v2  ;;  %436 = vmatprep.mubr.msk.f32.mxu0 %vm80_vm0, %v24_v6  ;;  %v32_v8 = vld [vmem:[%s666_s2] sm:$0xff]  ;;  %52 = vperm.xlu1 %480, %v34_v9   ;;  %v33_v10 = vld [vmem:[%s666_s2 + $0x8] sm:$0xff]  ;;  %v35_v11 = vld [vmem:[%s666_s2 + $0x18] sm:$0xff] }
   0x4   :  { %463 = vmatprep.subr.bf16.mxu0 %v462_v4  ;;  %42 = vperm.xlu0 %479, %v32_v8   ;;  %v25_v12 = vld [vmem:[%s665_s1 + $0x8] sm:$0xff]  ;;  %v26_v13 = vld [vmem:[%s665_s1 + $0x10] sm:$0xff]  ;;  %v36_v14 = vld [vmem:[%s666_s2 + $0x20] sm:$0xff] }
   0x5   :  { %465 = vmatpush3.bf16.msra.mxu0 %v462_v4  ;;  %v37_v15 = vld [vmem:[%s666_s2 + $0x28] sm:$0xff]  ;;  %v27_v16 = vld [vmem:[%s665_s1 + $0x18] sm:$0xff]  ;;  %v28_v17 = vld [vmem:[%s665_s1 + $0x20] sm:$0xff] }
   0x6   :  { %467 = vmatprep.subr.bf16.mxu0 %v466_v7  ;;  %v38_v18 = vld [vmem:[%s666_s2 + $0x30] sm:$0xff]  ;;  %v39_v19 = vld [vmem:[%s666_s2 + $0x38] sm:$0xff]  ;;  %v29_v20 = vld [vmem:[%s665_s1 + $0x28] sm:$0xff] }
   0x7   :  { %57 = vperm.xlu1 %480, %v35_v11   ;;  %v30_v21 = vld [vmem:[%s665_s1 + $0x30] sm:$0xff]  ;;  %v250_v22 = vld [vmem:[%s667_s4] sm:$0xff]  ;;  %v251_v23 = vld [vmem:[%s667_s4 + $0x8] sm:$0xff] }
   0x8   :  { %47 = vperm.xlu0 %479, %v33_v10   ;;  %v31_v24 = vld [vmem:[%s665_s1 + $0x38] sm:$0xff]  ;;  %v252_v25 = vld [vmem:[%s667_s4 + $0x10] sm:$0xff]  ;;  %v246_v27 = vld [vmem:[%s668_s3] sm:$0xff] }
   0x9   :  { %469 = vmatpush3.bf16.msra.mxu0 %v466_v7  ;;  %v253_v26 = vld [vmem:[%s667_s4 + $0x18] sm:$0xff]  ;;  %456 = vmatprep.mubr.msk.f32.mxu1 %vm80_vm0, %v246_v27  ;;  %v247_v6 = vld [vmem:[%s668_s3 + $0x8] sm:$0xff]  ;;  %v248_v7 = vld [vmem:[%s668_s3 + $0x10] sm:$0xff] }
   0xa   :  { %v249_v8 = vld [vmem:[%s668_s3 + $0x18] sm:$0xff] }
   0xb   :  { %67 = vperm.xlu1 %480, %v37_v15  }
   0xc   :  { %437 = vmatmul.mubr.msk.f32.vlgmr.msra.gmra.mrb[0].mxu0 %vm80_vm0, %v25_v12  ;;  %62 = vperm.xlu0 %479, %v36_v14  }
   0xd   :  { %439 = vmatprep.mubr.msk.f32.mxu0 %vm80_vm0, %v26_v13 }
   0xf   :  { %77 = vperm.xlu1 %480, %v39_v19  }
  0x10   :  { %440 = vmatmul.mubr.msk.f32.gmra.mrb[2].mxu0 %vm80_vm0, %v27_v16  ;;  %72 = vperm.xlu0 %479, %v38_v18  }
  0x11   :  { %442 = vmatprep.mubr.msk.f32.mxu0 %vm80_vm0, %v28_v17 }
  0x13   :  { %261 = vperm.xlu1 %480, %v251_v23  }
  0x14   :  { %443 = vmatmul.mubr.msk.f32.gmra.mrb[4].mxu0 %vm80_vm0, %v29_v20  ;;  %256 = vperm.xlu0 %479, %v250_v22  }
  0x15   :  { %445 = vmatprep.mubr.msk.f32.mxu0 %vm80_vm0, %v30_v21 }
  0x17   :  { %271 = vperm.xlu1 %480, %v253_v26  }
  0x18   :  { %446 = vmatmul.mubr.msk.f32.gmra.mrb[6].mxu0 %vm80_vm0, %v31_v24  ;;  %266 = vperm.xlu0 %479, %v252_v25  }
  0x82   :  { %v53_v29 = vpop.permute.xlu1 %52 }
  0x83   :  { %v43_v28 = vpop.permute.xlu0 %42 }
  0x86   :  { %v58_v36 = vpop.permute.xlu1 %57 }
  0x87   :  { %v48_v30 = vpop.permute.xlu0 %47 }
  0x8a   :  { %v68_v9 = vpop.permute.xlu1 %67 }
  0x8b   :  { %v63_v10 = vpop.permute.xlu0 %62 }
  0x8e   :  { %v78_v13 = vpop.permute.xlu1 %77 }
  0x8f   :  { %v73_v14 = vpop.permute.xlu0 %72 }
  0x92   :  { %v262_v21 = vpop.permute.xlu1 %261 }
  0x93   :  { %v257_v22 = vpop.permute.xlu0 %256 }
  0xdf   :  { %v438_v31 = vpop.f32.mrb[0].mxu0 }
  0xe0   :  { %v177_v32 = vadd.f32 %v438_v31, %v48_v30  ;;  %v171_v33 = vpop.f32.mrb[1].mxu0  ;;  %v267_v31 = vpop.permute.xlu0 %266 }
  0xe1   :  { %v172_v34 = vadd.f32 %v171_v33, %v43_v28 }
  0xe2   :  { %v211_v35 = vmul.f32 0.5, %v177_v32 }
  0xe3   :  { %v210_v37 = vmul.f32 0.5, %v172_v34  ;;  %v441_v38 = vpop.f32.mrb[2].mxu0 }
  0xe4   :  { %481 = vtanh.f32 %v211_v35  ;;  %v187_v39 = vadd.f32 %v441_v38, %v58_v36  ;;  %v181_v40 = vpop.f32.mrb[3].mxu0 }
  0xe5   :  { %483 = vtanh.f32 %v210_v37  ;;  %v182_v41 = vadd.f32 %v181_v40, %v53_v29  ;;  %v272_v29 = vpop.permute.xlu1 %271 }
  0xe6   :  { %v213_v42 = vmul.f32 0.5, %v187_v39 }
  0xe7   :  { %v212_v43 = vmul.f32 0.5, %v182_v41  ;;  %v444_v44 = vpop.f32.mrb[4].mxu0 }
  0xe8   :  { %485 = vtanh.f32 %v213_v42  ;;  %v191_v45 = vpop.f32.mrb[5].mxu0  ;;  %v197_v11 = vadd.f32 %v444_v44, %v68_v9 }
  0xe9   :  { %487 = vtanh.f32 %v212_v43  ;;  %v192_v12 = vadd.f32 %v191_v45, %v63_v10 }
  0xea   :  { %v215_v15 = vmul.f32 0.5, %v197_v11 }
  0xeb   :  { %v447_v46 = vpop.f32.mrb[6].mxu0  ;;  %v214_v17 = vmul.f32 0.5, %v192_v12 }
  0xec   :  { %v201_v47 = vpop.f32.mrb[7].mxu0  ;;  %v207_v16 = vadd.f32 %v447_v46, %v78_v13  ;;  %489 = vtanh.f32 %v215_v15 }
  0xed   :  { %v202_v18 = vadd.f32 %v201_v47, %v73_v14  ;;  %491 = vtanh.f32 %v214_v17 }
  0xee   :  { %v482_v48 = vpop.eup %481  ;;  %v217_v19 = vmul.f32 0.5, %v207_v16 }
  0xef   :  { %v484_v49 = vpop.eup %483  ;;  %v227_v50 = vadd.f32 1.0, %v482_v48  ;;  %v216_v20 = vmul.f32 0.5, %v202_v18 }
  0xf0   :  { %v226_v51 = vadd.f32 1.0, %v484_v49  ;;  %493 = vtanh.f32 %v217_v19 }
  0xf1   :  { %v235_v52 = vmul.f32 0.5, %v227_v50  ;;  %495 = vtanh.f32 %v216_v20 }
  0xf2   :  { %v486_v53 = vpop.eup %485  ;;  %v234_v54 = vmul.f32 0.5, %v226_v51 }
  0xf3   :  { %v488_v55 = vpop.eup %487  ;;  %v229_v56 = vadd.f32 1.0, %v486_v53  ;;  %v243_v57 = vmul.f32 %v235_v52, %v544_v1 }
  0xf4   :  { %v228_v58 = vadd.f32 1.0, %v488_v55  ;;  %v242_v59 = vmul.f32 %v234_v54, %v539_v0 }
  0xf5   :  { %v237_v60 = vmul.f32 0.5, %v229_v56 }
  0xf6   :  { %v236_v61 = vmul.f32 0.5, %v228_v58  ;;  %v470_v62 = vpack.c.bf16 %v243_v57, %v242_v59  ;;  %v490_v27 = vpop.eup %489 }
  0xf7   :  { %v245_v63 = vmul.f32 %v237_v60, %v556_v5  ;;  %v492_v28 = vpop.eup %491  ;;  %v231_v34 = vadd.f32 1.0, %v490_v27 }
  0xf8   :  { %471 = vmatprep.subr.bf16.mxu1 %v470_v62  ;;  %v244_v3 = vmul.f32 %v236_v61, %v549_v2  ;;  %v230_v37 = vadd.f32 1.0, %v492_v28 }
  0xf9   :  { %473 = vmatpush3.bf16.msra.mxu1 %v470_v62  ;;  %v239_v39 = vmul.f32 0.5, %v231_v34 }
  0xfa   :  { %v474_v4 = vpack.c.bf16 %v245_v63, %v244_v3  ;;  %v494_v36 = vpop.eup %493  ;;  %v238_v41 = vmul.f32 0.5, %v230_v37 }
  0xfb   :  { %v496_v38 = vpop.eup %495  ;;  %v233_v40 = vadd.f32 1.0, %v494_v36  ;;  %v376_v45 = vsub.f32 1.0, %v239_v39 }
  0xfc   :  { %475 = vmatprep.subr.bf16.mxu1 %v474_v4  ;;  %v232_v42 = vadd.f32 1.0, %v496_v38  ;;  %v375_v48 = vsub.f32 1.0, %v238_v41 }
  0xfd   :  { %477 = vmatpush3.bf16.msra.mxu1 %v474_v4  ;;  %v241_v46 = vmul.f32 0.5, %v233_v40 }
  0xfe   :  { %v240_v49 = vmul.f32 0.5, %v232_v42 }
  0xff   :  { %v378_v55 = vsub.f32 1.0, %v241_v46 }
 0x100   :  { %457 = vmatmul.mubr.msk.f32.vlgmr.msra.gmra.mrb[0].mxu1 %vm80_vm0, %v247_v6  ;;  %v377_v57 = vsub.f32 1.0, %v240_v49 }
 0x101   :  { %459 = vmatprep.mubr.msk.f32.mxu1 %vm80_vm0, %v248_v7 }
 0x104   :  { %460 = vmatmul.mubr.msk.f32.gmra.mrb[2].mxu1 %vm80_vm0, %v249_v8 }
 0x1d3   :  { %v458_v23 = vpop.f32.mrb[0].mxu1 }
 0x1d4   :  { %v358_v24 = vadd.f32 %v458_v23, %v262_v21  ;;  %v352_v25 = vpop.f32.mrb[1].mxu1 }
 0x1d5   :  { %v353_v26 = vadd.f32 %v352_v25, %v257_v22 }
 0x1d6   :  { %497 = vtanh.f32 %v358_v24 }
 0x1d7   :  { %499 = vtanh.f32 %v353_v26  ;;  %v461_v30 = vpop.f32.mrb[2].mxu1 }
 0x1d8   :  { %v368_v32 = vadd.f32 %v461_v30, %v272_v29  ;;  %v362_v33 = vpop.f32.mrb[3].mxu1 }
 0x1d9   :  { %v363_v35 = vadd.f32 %v362_v33, %v267_v31 }
 0x1da   :  { %501 = vtanh.f32 %v368_v32 }
 0x1db   :  { %503 = vtanh.f32 %v363_v35 }
 0x1e0   :  { %v498_v43 = vpop.eup %497 }
 0x1e1   :  { %v500_v44 = vpop.eup %499  ;;  %v380_v47 = vsub.f32 %v498_v43, %v544_v1 }
 0x1e2   :  { %v379_v50 = vsub.f32 %v500_v44, %v539_v0 }
 0x1e3   :  { %v384_v51 = vmul.f32 %v380_v47, %v376_v45 }
 0x1e4   :  { %v502_v52 = vpop.eup %501  ;;  %v383_v53 = vmul.f32 %v379_v50, %v375_v48 }
 0x1e5   :  { %v504_v54 = vpop.eup %503  ;;  %389 = vst.msk [vmem:[%s669_s5 + $0x8] sm:$0xff] %vm387_vm1, %v384_v51  ;;  %v382_v56 = vsub.f32 %v502_v52, %v556_v5 }
 0x1e6   :  { %388 = vst.msk [vmem:[%s669_s5] sm:$0xff] %vm387_vm1, %v383_v53  ;;  %v381_v1 = vsub.f32 %v504_v54, %v549_v2 }
 0x1e7   :  { %v386_v58 = vmul.f32 %v382_v56, %v378_v55 }
 0x1e8   :  { %v385_v0 = vmul.f32 %v381_v1, %v377_v57 }
 0x1e9   :  { %391 = vst.msk [vmem:[%s669_s5 + $0x18] sm:$0xff] %vm387_vm1, %v386_v58 }
 0x1ea   :  { %390 = vst.msk [vmem:[%s669_s5 + $0x10] sm:$0xff] %vm387_vm1, %v385_v0 }

</bundles_post_ra>
